<compile_context>
chip_gen: v6e
topology: v6e:2x2x1
jax: 0.10.0
libtpu: 0.0.40
codegen_flags: <defaults>
</compile_context>

<pallas_src>
import functools

import jax
import jax.numpy as jnp
from jax.experimental import pallas as pl
from jax.experimental.pallas import tpu as pltpu


_BLOCK_BUDGET_BYTES = 4 << 20   # ~4 MiB/block: near HBM roofline, amortizes per-step overhead
_VMEM_LIMIT_BYTES = 32 << 20    # <= default scoped VMEM on v6e/v7x; raises v5e's 16 MiB default


def _round_down(v, m):
    return (v // m) * m


def _round_up(v, m):
    return -(-v // m) * m


def _choose_tiles(R, S, itemsize):
    """Byte-budgeted tiles (tr, ts) for a (R, S) row-major array.

    Prefers full-row blocks (ts == S -> one contiguous DMA per block).
    tr is a multiple of 8 (or full R), ts is a multiple of 128 (or full S).
    Grids are built with pl.cdiv, so tiles never need to divide R / S exactly.
    """
    row_bytes = S * itemsize
    tr_cap = R if R <= 8 else _round_down(R, 8)
    if 8 * row_bytes <= _BLOCK_BUDGET_BYTES:
        # Full-row contiguous blocks.
        ts = S
        tr = min(tr_cap, max(8, _round_down(_BLOCK_BUDGET_BYTES // row_bytes, 8)))
        # Megacore: the row axis is the only multi-block parallel axis here,
        # so make sure it has >= 2 blocks when possible.
        if R >= 16:
            half = _round_up(-(-R // 2), 8)
            if half < R:
                tr = min(tr, half)
    else:
        # Rows too wide for full-row blocks: lane-tile the spatial axis.
        tr = min(R, 8)
        ts = max(128, _round_down(_BLOCK_BUDGET_BYTES // (tr * itemsize), 128))
    return tr, ts


def _row_reduce_kernel(x_ref, sum_ref, sumsq_ref, *acc_refs, s_total, ts, lane_acc):
    """Accumulate per-row sum and sum-of-squares of x across the spatial axis."""
    j = pl.program_id(1)

    @pl.when(j == 0)
    def _():
        if lane_acc:
            acc_refs[0][...] = jnp.zeros_like(acc_refs[0])
            acc_refs[1][...] = jnp.zeros_like(acc_refs[1])
        else:
            sum_ref[...] = jnp.zeros_like(sum_ref)
            sumsq_ref[...] = jnp.zeros_like(sumsq_ref)

    x = x_ref[...].astype(jnp.float32)
    # cdiv grid: mask columns past S so padded lanes don't pollute the sums.
    # (Padded *rows* only write to discarded out-of-bounds output rows.)
    col = j * ts + jax.lax.broadcasted_iota(jnp.int32, x.shape, 1)
    x = jnp.where(col < s_total, x, 0.0)

    if lane_acc:
        acc_sum, acc_sq = acc_refs
        tr = x.shape[0]
        xr = x.reshape(tr, ts // 128, 128)
        # Lane-dense partial reduce (VALU adds); defer the cross-lane reduce.
        acc_sum[...] += jnp.sum(xr, axis=1)
        acc_sq[...] += jnp.sum(xr * xr, axis=1)

        @pl.when(j == pl.num_programs(1) - 1)
        def _():
            sum_ref[...] = jnp.sum(acc_sum[...], axis=1, keepdims=True)
            sumsq_ref[...] = jnp.sum(acc_sq[...], axis=1, keepdims=True)
    else:
        sum_ref[...] += jnp.sum(x, axis=1, keepdims=True)
        sumsq_ref[...] += jnp.sum(x * x, axis=1, keepdims=True)


def _row_reduce(x2d, tr, ts):
    R, S = x2d.shape
    grid = (pl.cdiv(R, tr), pl.cdiv(S, ts))
    lane_acc = grid[1] > 1
    if lane_acc:
        assert ts % 128 == 0
    kernel = functools.partial(_row_reduce_kernel, s_total=S, ts=ts, lane_acc=lane_acc)
    scratch = [pltpu.VMEM((tr, 128), jnp.float32)] * 2 if lane_acc else []
    itemsize = x2d.dtype.itemsize
    return pl.pallas_call(
        kernel,
        out_shape=(
            jax.ShapeDtypeStruct((R, 1), jnp.float32),
            jax.ShapeDtypeStruct((R, 1), jnp.float32),
        ),
        grid=grid,
        in_specs=[pl.BlockSpec((tr, ts), lambda i, j: (i, j))],
        out_specs=(
            pl.BlockSpec((tr, 1), lambda i, j: (i, 0)),
            pl.BlockSpec((tr, 1), lambda i, j: (i, 0)),
        ),
        scratch_shapes=scratch,
        compiler_params=pltpu.CompilerParams(
            dimension_semantics=("parallel", "arbitrary"),
            vmem_limit_bytes=_VMEM_LIMIT_BYTES),
        cost_estimate=pl.CostEstimate(
            flops=3 * R * S,
            bytes_accessed=R * S * itemsize + 2 * R * 4,
            transcendentals=0),
    )(x2d)


def _affine_kernel(x_ref, p_ref, y_ref):
    """y = scale_row * (x + loc_row); params packed as (rows, [loc, scale])."""
    x = x_ref[...].astype(jnp.float32)
    p = p_ref[...]
    loc = p[:, 0:1]
    scale = p[:, 1:2]
    y_ref[...] = (scale * (x + loc)).astype(y_ref.dtype)


def _affine_apply(x2d, params_rows, tr, ts):
    R, S = x2d.shape
    grid = (pl.cdiv(R, tr), pl.cdiv(S, ts))
    itemsize = x2d.dtype.itemsize
    return pl.pallas_call(
        _affine_kernel,
        out_shape=jax.ShapeDtypeStruct((R, S), x2d.dtype),
        grid=grid,
        in_specs=[
            pl.BlockSpec((tr, ts), lambda i, j: (i, j)),
            pl.BlockSpec((tr, 2), lambda i, j: (i, 0)),
        ],
        out_specs=pl.BlockSpec((tr, ts), lambda i, j: (i, j)),
        compiler_params=pltpu.CompilerParams(
            dimension_semantics=("parallel", "parallel"),
            vmem_limit_bytes=_VMEM_LIMIT_BYTES),
        cost_estimate=pl.CostEstimate(
            flops=2 * R * S,
            bytes_accessed=2 * R * S * itemsize + 2 * R * 4,
            transcendentals=0),
    )(x2d, params_rows)


def vector_actnorm_forward(x, loc, scale, initialized):
    """Mirrors VectorActNorm.forward(input, reverse=False) with logdet=True.

    `initialized` is a static Python bool (mirrors the PyTorch host-side
    `self.initialized` buffer check).
    Returns (output, logdet_vec, new_loc, new_scale, new_initialized).
    """
    if x.ndim == 2:
        x = x[:, :, None, None]
    B, C, H, W = x.shape
    R = B * C
    S = H * W
    n = B * H * W

    x2d = x.reshape(R, S)                          # free row-major view, no transpose
    tr, ts = _choose_tiles(R, S, x2d.dtype.itemsize)

    if not initialized:
        # Single fused reduction pass: per-row sum and sum-of-squares.
        # var = (sumsq - sum^2/n) / (n-1)   (matches torch.std, ddof=1).
        # TODO(synk): single-pass variance can lose precision vs. the two-pass
        # centered form when |mean| >> std; acceptable for the one-time init.
        row_sum, row_sumsq = _row_reduce(x2d, tr, ts)
        sum_c = row_sum.reshape(B, C).sum(axis=0)       # (C,)
        sumsq_c = row_sumsq.reshape(B, C).sum(axis=0)   # (C,)
        mean_c = sum_c / n
        var_c = jnp.maximum(sumsq_c - sum_c * mean_c, 0.0) / max(n - 1, 1)
        std_c = jnp.sqrt(var_c)
        loc_c = -mean_c
        scale_c = 1.0 / (std_c + 1e-6)
        new_loc = loc_c.reshape(1, C, 1, 1)
        new_scale = scale_c.reshape(1, C, 1, 1)
    else:
        loc_c = loc.reshape(C).astype(jnp.float32)
        scale_c = scale.reshape(C).astype(jnp.float32)
        new_loc, new_scale = loc, scale

    # Pack per-channel params into one per-row (R, 2) [loc, scale] side stream
    # (row r = b*C + c).
    loc_rows = jnp.tile(loc_c, B)
    scale_rows = jnp.tile(scale_c, B)
    params_rows = jnp.stack([loc_rows, scale_rows], axis=1).astype(jnp.float32)
    y2d = _affine_apply(x2d, params_rows, tr, ts)

    y = y2d.reshape(B, C, H, W)
    # .squeeze(3).squeeze(2): only drops size-1 spatial dims.
    if W == 1:
        y = jnp.squeeze(y, axis=3)
    if H == 1:
        y = jnp.squeeze(y, axis=2)

    # logdet = H*W * sum(log|scale|): C scalars, computed outside the kernel.
    logdet = (H * W) * jnp.sum(jnp.log(jnp.abs(scale_c)))
    logdet_vec = logdet.astype(x.dtype) * jnp.ones((B,), dtype=x.dtype)
    return y, logdet_vec, new_loc, new_scale, True


def _reference(x):
    """Pure-JAX reference for the init-path forward."""
    B, C, H, W = x.shape
    flat = jnp.transpose(x, (1, 0, 2, 3)).reshape(C, -1)
    mean_r = flat.mean(axis=1)
    std_r = jnp.std(flat, axis=1, ddof=1)
    loc_r = -mean_r
    scale_r = 1.0 / (std_r + 1e-6)
    y_r = scale_r[None, :, None, None] * (x + loc_r[None, :, None, None])
    logdet_r = H * W * jnp.sum(jnp.log(jnp.abs(scale_r))) * jnp.ones((B,), jnp.float32)
    return y_r, logdet_r, loc_r, scale_r


if __name__ == "__main__":
    key = jax.random.PRNGKey(0)

    # --- Main shape: (B, C, H, W) = (2, 4, 16, 16), init path + apply path. ---
    B, C, H, W = 2, 4, 16, 16
    x = jax.random.normal(key, (B, C, H, W), dtype=jnp.float32) * 2.0 + 0.5

    loc0 = jnp.zeros((1, C, 1, 1), dtype=jnp.float32)
    scale0 = jnp.ones((1, C, 1, 1), dtype=jnp.float32)

    y, logdet_vec, new_loc, new_scale, init_flag = vector_actnorm_forward(
        x, loc0, scale0, initialized=False)
    jax.block_until_ready((y, logdet_vec, new_loc, new_scale))

    y_r, logdet_r, loc_r, scale_r = _reference(x)
    assert jnp.allclose(y, y_r, rtol=1e-5, atol=1e-5)
    assert jnp.allclose(logdet_vec, logdet_r, rtol=1e-5, atol=1e-5)
    assert jnp.allclose(new_loc.reshape(-1), loc_r, rtol=1e-5, atol=1e-5)
    assert jnp.allclose(new_scale.reshape(-1), scale_r, rtol=1e-5, atol=1e-5)

    # Second call (initialized == 1): uses stored params (apply kernel only).
    y2, logdet_vec2, _, _, _ = vector_actnorm_forward(
        x, new_loc, new_scale, initialized=True)
    jax.block_until_ready((y2, logdet_vec2))
    assert jnp.allclose(y2, y_r, rtol=1e-5, atol=1e-5)
    assert jnp.allclose(logdet_vec2, logdet_r, rtol=1e-5, atol=1e-5)

    # --- Awkward (non-divisible) shape: exercises cdiv-grid padding and the
    # --- >=2-row-block split. (B, C, H, W) = (3, 7, 5, 6).
    B2, C2, H2, W2 = 3, 7, 5, 6
    x2 = jax.random.normal(jax.random.PRNGKey(1), (B2, C2, H2, W2),
                           dtype=jnp.float32) * 1.5 - 0.3
    y3, logdet3, loc3, scale3, _ = vector_actnorm_forward(
        x2, jnp.zeros((1, C2, 1, 1), jnp.float32),
        jnp.ones((1, C2, 1, 1), jnp.float32), initialized=False)
    jax.block_until_ready((y3, logdet3))
    y3_r, logdet3_r, loc3_r, scale3_r = _reference(x2)
    assert jnp.allclose(y3, y3_r, rtol=1e-5, atol=1e-5)
    assert jnp.allclose(logdet3, logdet3_r, rtol=1e-5, atol=1e-5)
    assert jnp.allclose(loc3.reshape(-1), loc3_r, rtol=1e-5, atol=1e-5)
    assert jnp.allclose(scale3.reshape(-1), scale3_r, rtol=1e-5, atol=1e-5)

    print("KERNEL_OK")
</pallas_src>

<mosaic_0001>
module attributes {stable_mosaic.version = 11 : i64} {
  func.func @_row_reduce_kernel(%arg0: i32, %arg1: i32, %arg2: memref<8x256xf32, #tpu.memory_space<vmem>>, %arg3: memref<8x1xf32, #tpu.memory_space<vmem>>, %arg4: memref<8x1xf32, #tpu.memory_space<vmem>>) attributes {dimension_semantics = [#tpu.dimension_semantics<parallel>, #tpu.dimension_semantics<arbitrary>], iteration_bounds = array<i64: 1, 1>, scalar_prefetch = 0 : i64, scratch_operands = 0 : i64, tpu.core_type = #tpu.core_type<tc>, window_params = [{transform_indices = @transform_0, window_bounds = array<i64: 8, 256>}, {transform_indices = @transform_1, window_bounds = array<i64: 8, 1>}, {transform_indices = @transform_2, window_bounds = array<i64: 8, 1>}]} {
    %c0_i32 = arith.constant 0 : i32
    %0 = arith.cmpi eq, %arg1, %c0_i32 : i32
    %1 = arith.extui %0 : i1 to i32
    %c0_i32_0 = arith.constant 0 : i32
    %2 = arith.cmpi ne, %1, %c0_i32_0 : i32
    scf.if %2 {
      %cst_13 = arith.constant 0.000000e+00 : f32
      %23 = vector.broadcast %cst_13 : f32 to vector<8x1xf32>
      %c0_14 = arith.constant 0 : index
      %c0_15 = arith.constant 0 : index
      %24 = vector.load %arg3[%c0_14, %c0_15] : memref<8x1xf32, #tpu.memory_space<vmem>>, vector<8x1xf32>
      tpu.vector_store %arg3[%c0_14, %c0_15], %23 {strides = array<i32>} : memref<8x1xf32, #tpu.memory_space<vmem>>, vector<8x1xf32>,
      %cst_16 = arith.constant 0.000000e+00 : f32
      %25 = vector.broadcast %cst_16 : f32 to vector<8x1xf32>
      %c0_17 = arith.constant 0 : index
      %c0_18 = arith.constant 0 : index
      %26 = vector.load %arg4[%c0_17, %c0_18] : memref<8x1xf32, #tpu.memory_space<vmem>>, vector<8x1xf32>
      tpu.vector_store %arg4[%c0_17, %c0_18], %25 {strides = array<i32>} : memref<8x1xf32, #tpu.memory_space<vmem>>, vector<8x1xf32>,
    } else {
    }
    %c0 = arith.constant 0 : index
    %c0_1 = arith.constant 0 : index
    %3 = vector.load %arg2[%c0, %c0_1] : memref<8x256xf32, #tpu.memory_space<vmem>>, vector<8x256xf32>
    %c256_i32 = arith.constant 256 : i32
    %4 = arith.muli %arg1, %c256_i32 : i32
    %5 = tpu.iota {dimensions = array<i32: 1>} : vector<8x256xi32>
    %6 = vector.broadcast %4 : i32 to vector<8x256xi32>
    %7 = arith.addi %6, %5 : vector<8x256xi32>
    %c256_i32_2 = arith.constant 256 : i32
    %8 = vector.broadcast %c256_i32_2 : i32 to vector<8x256xi32>
    %9 = arith.cmpi slt, %7, %8 : vector<8x256xi32>
    %cst = arith.constant 0.000000e+00 : f32
    %10 = vector.broadcast %cst : f32 to vector<8x256xf32>
    %11 = arith.select %9, %3, %10 : vector<8x256xi1>, vector<8x256xf32>
    %c0_3 = arith.constant 0 : index
    %c0_4 = arith.constant 0 : index
    %12 = vector.load %arg3[%c0_3, %c0_4] : memref<8x1xf32, #tpu.memory_space<vmem>>, vector<8x1xf32>
    %cst_5 = arith.constant dense<0.000000e+00> : vector<8xf32>
    %13 = vector.multi_reduction <add>, %11, %cst_5 [1] : vector<8x256xf32> to vector<8xf32>
    %14 = vector.shape_cast %13 : vector<8xf32> to vector<8x1xf32>
    %15 = arith.addf %12, %14 : vector<8x1xf32>
    %c0_6 = arith.constant 0 : index
    %c0_7 = arith.constant 0 : index
    %16 = vector.load %arg3[%c0_6, %c0_7] : memref<8x1xf32, #tpu.memory_space<vmem>>, vector<8x1xf32>
    tpu.vector_store %arg3[%c0_6, %c0_7], %15 {strides = array<i32>} : memref<8x1xf32, #tpu.memory_space<vmem>>, vector<8x1xf32>,
    %c0_8 = arith.constant 0 : index
    %c0_9 = arith.constant 0 : index
    %17 = vector.load %arg4[%c0_8, %c0_9] : memref<8x1xf32, #tpu.memory_space<vmem>>, vector<8x1xf32>
    %18 = arith.mulf %11, %11 : vector<8x256xf32>
    %cst_10 = arith.constant dense<0.000000e+00> : vector<8xf32>
    %19 = vector.multi_reduction <add>, %18, %cst_10 [1] : vector<8x256xf32> to vector<8xf32>
    %20 = vector.shape_cast %19 : vector<8xf32> to vector<8x1xf32>
    %21 = arith.addf %17, %20 : vector<8x1xf32>
    %c0_11 = arith.constant 0 : index
    %c0_12 = arith.constant 0 : index
    %22 = vector.load %arg4[%c0_11, %c0_12] : memref<8x1xf32, #tpu.memory_space<vmem>>, vector<8x1xf32>
    tpu.vector_store %arg4[%c0_11, %c0_12], %21 {strides = array<i32>} : memref<8x1xf32, #tpu.memory_space<vmem>>, vector<8x1xf32>,
    return
  }
  func.func @transform_0(%arg0: i32, %arg1: i32) -> (i32, i32) {
    %c0_i32 = arith.constant 0 : i32
    return %arg0, %arg1 : i32, i32
  }
  func.func @transform_1(%arg0: i32, %arg1: i32) -> (i32, i32) {
    %c0_i32 = arith.constant 0 : i32
    %c0_i32_0 = arith.constant 0 : i32
    return %arg0, %c0_i32 : i32, i32
  }
  func.func @transform_2(%arg0: i32, %arg1: i32) -> (i32, i32) {
    %c0_i32 = arith.constant 0 : i32
    %c0_i32_0 = arith.constant 0 : i32
    return %arg0, %c0_i32 : i32, i32
  }
}

</mosaic_0001>

<bundles_post_ra>
// kernel: tpu_custom_call.1
= control target key start
LH: loop header
LB: loop body
LE: loop exit
PB: predicated region body
PF: predicated region fallthrough
CT: control target
= control target key end

     0   :  { %8 = vsyncpa [#allocation3], 0  ;;  %s90_s9 = smov [#allocation2]   ;;  %s132_s0 = inlined_call_operand.hbm [shape: f32[8,256], index: 0, kind: input, shape index: {}]   ;;  %s133_s1 = inlined_call_operand.vmem [shape: f32[8,1], index: 1, kind: output, shape index: {0}]   ;;  %s134_s2 = inlined_call_operand.vmem [shape: f32[8,1], index: 2, kind: output, shape index: {1}]  }
   0x1   :  { %s15_s10 = sshll.u32 %s90_s9, 4  ;;  %s16_s10 = int_to_ptr.vmem [resolvable:$true] %s15_s10 }
   0x2   :  { %s76_s11 = scalar_lea.vmem %s16_s10, 256  ;;  %p81_p1 = scmp.lt.s32.totalorder %s16_s10, %s16_s10 }
   0x3   :  { %p77_p0 = scmp.ne.s32.totalorder %s16_s10, %s76_s11  ;;  %p82_p2 = scmp.lt.s32.totalorder %s76_s11, %s76_s11 }
   0x5   :  { %p83_p3 = por %p82_p2, %p81_p1 }
   0x7   :  { %p84_p4 = pnand %p83_p3, %p77_p0 }
   0x9   :  { %87 = shalt.err (!%p84_p4)
}
   0xa   :  { %18 = dma.hbm_to_vmem [thread:$0]  %s132_s0, 256, %s16_s10, [#allocation3]  }
   0xb   :  { %88 = dma.done.wait [#allocation3], 256  }
   0xc   :  { %89 = vsyncadd [#allocation3], 4294967040  ;;  %vm26_vm0 = vcmask 7168   ;;  %v91_v0 = vmov 0.0   ;;  %v29_v1 = vld [vmem:[#allocation2] sm:$0xff]  ;;  %v30_v2 = vld [vmem:[#allocation2 + $0x8] sm:$0xff] }
   0xd   :  { %27 = vst.msk [vmem:[%s133_s1] sm:$0xff] %vm26_vm0, %v91_v0  ;;  %28 = vst.msk [vmem:[%s134_s2] sm:$0xff] %vm26_vm0, %v91_v0  ;;  %v43_v3 = vadd.f32 %v30_v2, %v29_v1  ;;  %v50_v4 = vmul.f32 %v29_v1, %v29_v1  ;;  %v51_v5 = vmul.f32 %v30_v2, %v30_v2 }
   0xf   :  { %44 = vadd.xlane.f32.xlu0 %v43_v3  ;;  %v52_v6 = vadd.f32 %v51_v5, %v50_v4 }
  0x13   :  { %53 = vadd.xlane.f32.xlu0 %v52_v6 }
  0x14   :  { %v42_v7 = vld [vmem:[%s133_s1] sm:$0xff] }
  0x15   :  { %v49_v10 = vld [vmem:[%s134_s2] sm:$0xff] }
  0x98   :  { %v45_v8 = vpop.xlane.xlu0 %44 }
  0x99   :  { %v46_v9 = vadd.f32 %v45_v8, %v42_v7 }
  0x9b   :  { %48 = vst.msk [vmem:[%s133_s1] sm:$0xff] %vm26_vm0, %v46_v9 }
  0x9c   :  { %v54_v11 = vpop.xlane.xlu0 %53 }
  0x9d   :  { %v55_v12 = vadd.f32 %v54_v11, %v49_v10 }
  0x9f   :  { %56 = vst.msk [vmem:[%s134_s2] sm:$0xff] %vm26_vm0, %v55_v12 }
  0xa0   :  { %65 = vsyncpa [#allocation3], 1 }

</bundles_post_ra>
